<compile_context>
chip_gen: v5e
topology: v5e:2x2
jax: 0.10.0
libtpu: 0.0.40
codegen_flags: <defaults>
</compile_context>

<pallas_src>
import jax
import jax.numpy as jnp
from jax.experimental import pallas as pl
from jax.experimental.pallas import tpu as pltpu


HIDDEN = 256  # width of MyModel.encoder (Linear(256,256) x 3)


def _round_up(x, m):
    return ((x + m - 1) // m) * m


def _vmem_limit_bytes():
    """Generation-split scoped-VMEM limit (review item)."""
    try:
        kind = jax.devices()[0].device_kind.lower()
    except Exception:
        kind = ""
    if "v5" in kind or "v6" in kind:
        return 96 * 1024 * 1024     # v5e / v6e: 128 MiB physical VMEM
    return 48 * 1024 * 1024         # v7x (64 MiB physical) or unknown: stay conservative


def _graph_head_kernel(bidx_ref, feats_ref, w_ref, b_ref, invc_ref, out_ref, acc_ref):
    """global_mean_pool (node-tiled reduction) + encoder MLP for one batch tile.

    Grid: (batch tiles ["parallel"], node tiles ["arbitrary", reduction]).

    bidx_ref : (1, TN)       int32, node -> graph id for this node tile (-1 = padding)
    feats_ref: (TN, 256)     GNN node embeddings for this node tile (f32 or bf16)
    w_ref    : (3, 256, 256) packed encoder weights, (in, out) layout, resident
    b_ref    : (1, 768)      packed encoder biases, f32
    invc_ref : (TB, 1)       f32, 1 / node count per graph (precomputed outside)
    out_ref  : (TB, 256)     graph_rep tile for graphs [i*TB, (i+1)*TB)
    acc_ref  : (TB, 256)     f32 pooled-sum accumulator scratch
    """
    k = pl.program_id(1)
    tb = out_ref.shape[0]
    cdt = feats_ref.dtype  # matmul-operand dtype (f32 or bf16)

    @pl.when(k == 0)
    def _():
        acc_ref[...] = jnp.zeros_like(acc_ref)

    # ---- one node-tile worth of masked sum: one-hot matmul on the MXU ----------
    first_graph = pl.program_id(0) * tb
    gids = jax.lax.broadcasted_iota(jnp.int32, (tb, 1), 0) + first_graph
    onehot = jnp.where(bidx_ref[...] == gids,                     # (TB, TN), built
                       jnp.ones((), cdt), jnp.zeros((), cdt))     # directly in cdt
    acc_ref[...] += jnp.dot(onehot, feats_ref[...],
                            preferred_element_type=jnp.float32)

    # ---- finalize: mean + encoder Linear -> ReLU -> Linear -> ReLU -> Linear ---
    @pl.when(k == pl.num_programs(1) - 1)
    def _():
        h = acc_ref[...] * invc_ref[...]                          # f32 mean pooling
        for layer in range(3):                                    # static unroll
            w = w_ref[layer]                                      # (256, 256)
            b = b_ref[:, pl.ds(layer * HIDDEN, HIDDEN)]           # (1, 256) f32
            h = jnp.dot(h.astype(cdt), w,
                        preferred_element_type=jnp.float32) + b   # bias add in f32
            if layer < 2:                                         # no ReLU after last
                h = jnp.maximum(h, 0.0)
        out_ref[...] = h.astype(out_ref.dtype)


def mymodel_forward(smiles_rep, node_feats, batch_idx, num_graphs, params, *,
                    tile_graphs=None, tile_nodes=None, compute_dtype=jnp.bfloat16):
    """Pallas forward for MyModel. Returns (smiles_rep, graph_rep).

    smiles_rep : (Bs, Ds)  precomputed SmilesRoBERTaEncoder output (pass-through)
    node_feats : (N, 256)  precomputed GNN node embeddings
    batch_idx  : (N,)      int32 node -> graph id (torch_geometric `batch`)
    params     : ((w0,b0),(w1,b1),(w2,b2)), w_k (256,256) in (in,out) layout
    """
    n_nodes = node_feats.shape[0]

    # Batch tile: multiple of 8, capped at 256 (MXU row width), and chosen so the batch
    # grid has >=2 steps whenever num_graphs > 8 (v7x has 2 TensorCores).
    if tile_graphs is None:
        tile_graphs = min(256, max(8, _round_up(-(-num_graphs // 2), 8)))
    tile_graphs = max(8, (tile_graphs // 8) * 8)
    b_pad = _round_up(num_graphs, tile_graphs)
    grid_b = b_pad // tile_graphs

    # Node tile (reduction axis): multiple of 128 so the (1, TN) batch-id block is
    # lane-aligned; 2048 keeps the (TB, TN) one-hot and the streamed feats block small.
    if tile_nodes is None:
        tile_nodes = min(2048, _round_up(n_nodes, 128))
    tile_nodes = max(128, (tile_nodes // 128) * 128)
    n_pad = _round_up(n_nodes, tile_nodes)
    grid_n = n_pad // tile_nodes

    (w0, b0), (w1, b1), (w2, b2) = params
    w_packed = jnp.stack([w0, w1, w2]).astype(compute_dtype)             # (3,256,256)
    b_packed = jnp.concatenate([b0, b1, b2]).reshape(1, 3 * HIDDEN)      # (1,768) f32
    b_packed = b_packed.astype(jnp.float32)

    feats = node_feats.astype(compute_dtype)                             # bf16 halves HBM bytes
    bidx = batch_idx.astype(jnp.int32)
    if n_pad > n_nodes:
        feats = jnp.pad(feats, ((0, n_pad - n_nodes), (0, 0)))
        bidx = jnp.pad(bidx, (0, n_pad - n_nodes), constant_values=-1)   # matches no graph
    bidx2d = bidx.reshape(1, n_pad)

    # Exact per-graph node counts computed outside the kernel (review item): keeps the
    # counts exact even with a bf16 one-hot and removes the in-kernel XLU row reduction.
    counts = jnp.zeros((b_pad,), jnp.float32).at[batch_idx.astype(jnp.int32)].add(1.0)
    inv_counts = (1.0 / jnp.maximum(counts, 1.0)).reshape(b_pad, 1)

    itemsize = jnp.dtype(compute_dtype).itemsize
    flops = 2 * b_pad * n_pad * HIDDEN + 3 * (2 * b_pad * HIDDEN * HIDDEN)
    bytes_accessed = (grid_b * (n_pad * HIDDEN * itemsize + n_pad * 4)   # feats + ids per batch tile
                      + w_packed.size * itemsize + b_packed.size * 4
                      + b_pad * 4 + b_pad * HIDDEN * 4)

    graph_rep = pl.pallas_call(
        _graph_head_kernel,
        out_shape=jax.ShapeDtypeStruct((b_pad, HIDDEN), jnp.float32),
        grid_spec=pltpu.PrefetchScalarGridSpec(
            num_scalar_prefetch=0,
            grid=(grid_b, grid_n),
            in_specs=[
                pl.BlockSpec((1, tile_nodes), lambda i, k: (0, k)),           # batch ids (streamed)
                pl.BlockSpec((tile_nodes, HIDDEN), lambda i, k: (k, 0)),      # node feats (streamed)
                pl.BlockSpec((3, HIDDEN, HIDDEN), lambda i, k: (0, 0, 0)),    # weights (small, resident)
                pl.BlockSpec((1, 3 * HIDDEN), lambda i, k: (0, 0)),           # biases
                pl.BlockSpec((tile_graphs, 1), lambda i, k: (i, 0)),          # 1/counts
            ],
            out_specs=pl.BlockSpec((tile_graphs, HIDDEN), lambda i, k: (i, 0)),
            scratch_shapes=[pltpu.VMEM((tile_graphs, HIDDEN), jnp.float32)],  # pooled-sum acc
        ),
        compiler_params=pltpu.CompilerParams(
            dimension_semantics=("parallel", "arbitrary"),   # batch tiles parallel, node axis reduces
            vmem_limit_bytes=_vmem_limit_bytes(),
        ),
        cost_estimate=pl.CostEstimate(flops=flops, transcendentals=0,
                                      bytes_accessed=bytes_accessed),
    )(bidx2d, feats, w_packed, b_packed, inv_counts)

    # TODO(synk): SmilesRoBERTaEncoder is an opaque pretrained transformer; its output
    # is passed through unchanged, matching `smiles_rep = self.smiles_encoder(smiles)`.
    return smiles_rep, graph_rep[:num_graphs]


def init_params(key):
    """PyTorch-default nn.Linear init; weights stored transposed as (in, out)."""
    dims = [(HIDDEN, HIDDEN)] * 3
    keys = jax.random.split(key, 2 * len(dims))
    params = []
    for i, (fan_in, fan_out) in enumerate(dims):
        bound = 1.0 / (fan_in ** 0.5)
        w = jax.random.uniform(keys[2 * i], (fan_in, fan_out),
                               minval=-bound, maxval=bound, dtype=jnp.float32)
        b = jax.random.uniform(keys[2 * i + 1], (fan_out,),
                               minval=-bound, maxval=bound, dtype=jnp.float32)
        params.append((w, b))
    return params


def reference_forward(smiles_rep, node_feats, batch_idx, num_graphs, params):
    """Pure-JAX reference: global_mean_pool + encoder MLP (f32)."""
    onehot = jax.nn.one_hot(batch_idx, num_graphs, dtype=jnp.float32)   # (N, B)
    counts = onehot.sum(axis=0)                                         # (B,)
    pooled = (onehot.T @ node_feats) / jnp.maximum(counts, 1.0)[:, None]
    (w0, b0), (w1, b1), (w2, b2) = params
    h = jnp.maximum(pooled @ w0 + b0, 0.0)
    h = jnp.maximum(h @ w1 + b1, 0.0)
    graph_rep = h @ w2 + b2
    return smiles_rep, graph_rep


if __name__ == "__main__":
    key = jax.random.PRNGKey(0)
    k_p, k_s, k_g = jax.random.split(key, 3)

    num_graphs = 16   # graphs in the batch
    n_nodes = 384     # total nodes across the batch (24 nodes / graph)
    smiles_dim = 768  # RoBERTa hidden size

    params = init_params(k_p)
    # Stand-ins for the untranslatable submodules' outputs:
    smiles_rep = jax.random.normal(k_s, (num_graphs, smiles_dim), dtype=jnp.float32)
    node_feats = jax.random.normal(k_g, (n_nodes, HIDDEN), dtype=jnp.float32)
    batch_idx = (jnp.arange(n_nodes, dtype=jnp.int32) * num_graphs) // n_nodes

    s_ref, g_ref = reference_forward(smiles_rep, node_feats, batch_idx,
                                     num_graphs, params)

    # f32 path with small tiles -> grid (2 batch tiles x 3 node tiles): exercises both
    # the "parallel" batch axis and the node-reduction accumulator path.
    s_out, g_out = mymodel_forward(smiles_rep, node_feats, batch_idx, num_graphs,
                                   params, tile_graphs=8, tile_nodes=128,
                                   compute_dtype=jnp.float32)
    jax.block_until_ready(g_out)
    assert s_out.shape == s_ref.shape and bool(jnp.all(s_out == s_ref))
    assert g_out.shape == (num_graphs, HIDDEN)
    assert jnp.allclose(g_out, g_ref, rtol=2e-3, atol=2e-3), \
        float(jnp.max(jnp.abs(g_out - g_ref)))

    # Default path: bf16 matmul operands (f32 accumulation), auto tile selection.
    _, g_bf16 = mymodel_forward(smiles_rep, node_feats, batch_idx, num_graphs, params)
    jax.block_until_ready(g_bf16)
    assert g_bf16.shape == (num_graphs, HIDDEN)
    assert jnp.allclose(g_bf16, g_ref, rtol=3e-2, atol=3e-2), \
        float(jnp.max(jnp.abs(g_bf16 - g_ref)))

    print("KERNEL_OK")
</pallas_src>

<mosaic_0001>
module attributes {stable_mosaic.version = 11 : i64} {
  func.func @_graph_head_kernel(%arg0: i32, %arg1: i32, %arg2: memref<1x128xi32, #tpu.memory_space<vmem>>, %arg3: memref<128x256xf32, #tpu.memory_space<vmem>>, %arg4: memref<3x256x256xf32, #tpu.memory_space<vmem>>, %arg5: memref<1x768xf32, #tpu.memory_space<vmem>>, %arg6: memref<8x1xf32, #tpu.memory_space<vmem>>, %arg7: memref<8x256xf32, #tpu.memory_space<vmem>>, %arg8: memref<8x256xf32, #tpu.memory_space<vmem>>) attributes {dimension_semantics = [#tpu.dimension_semantics<parallel>, #tpu.dimension_semantics<arbitrary>], iteration_bounds = array<i64: 2, 3>, scalar_prefetch = 0 : i64, scratch_operands = 1 : i64, tpu.core_type = #tpu.core_type<tc>, window_params = [{transform_indices = @transform_0, window_bounds = array<i64: 1, 128>}, {transform_indices = @transform_1, window_bounds = array<i64: 128, 256>}, {pipeline_mode = #tpu.pipeline_mode<synchronous>, transform_indices = @transform_2, window_bounds = array<i64: 3, 256, 256>}, {pipeline_mode = #tpu.pipeline_mode<synchronous>, transform_indices = @transform_3, window_bounds = array<i64: 1, 768>}, {transform_indices = @transform_4, window_bounds = array<i64: 8, 1>}, {transform_indices = @transform_5, window_bounds = array<i64: 8, 256>}]} {
    %c0_i32 = arith.constant 0 : i32
    %0 = arith.cmpi eq, %arg1, %c0_i32 : i32
    %1 = arith.extui %0 : i1 to i32
    %c0_i32_0 = arith.constant 0 : i32
    %2 = arith.cmpi ne, %1, %c0_i32_0 : i32
    scf.if %2 {
      %cst_11 = arith.constant 0.000000e+00 : f32
      %22 = vector.broadcast %cst_11 : f32 to vector<8x256xf32>
      %c0_12 = arith.constant 0 : index
      %c0_13 = arith.constant 0 : index
      %23 = vector.load %arg8[%c0_12, %c0_13] : memref<8x256xf32, #tpu.memory_space<vmem>>, vector<8x256xf32>
      tpu.vector_store %arg8[%c0_12, %c0_13], %22 {strides = array<i32>} : memref<8x256xf32, #tpu.memory_space<vmem>>, vector<8x256xf32>,
    } else {
    }
    %c8_i32 = arith.constant 8 : i32
    %3 = arith.muli %arg0, %c8_i32 : i32
    %4 = tpu.iota {dimensions = array<i32: 0>} : vector<8x1xi32>
    %5 = vector.broadcast %3 : i32 to vector<8x1xi32>
    %6 = arith.addi %4, %5 : vector<8x1xi32>
    %c0 = arith.constant 0 : index
    %c0_1 = arith.constant 0 : index
    %7 = vector.load %arg2[%c0, %c0_1] : memref<1x128xi32, #tpu.memory_space<vmem>>, vector<1x128xi32>
    %8 = vector.broadcast %7 : vector<1x128xi32> to vector<8x128xi32>
    %9 = vector.broadcast %6 : vector<8x1xi32> to vector<8x128xi32>
    %10 = arith.cmpi eq, %8, %9 : vector<8x128xi32>
    %cst = arith.constant 1.000000e+00 : f32
    %cst_2 = arith.constant 0.000000e+00 : f32
    %11 = vector.broadcast %cst : f32 to vector<8x128xf32>
    %12 = vector.broadcast %cst_2 : f32 to vector<8x128xf32>
    %13 = arith.select %10, %11, %12 : vector<8x128xi1>, vector<8x128xf32>
    %c0_3 = arith.constant 0 : index
    %c0_4 = arith.constant 0 : index
    %14 = vector.load %arg8[%c0_3, %c0_4] : memref<8x256xf32, #tpu.memory_space<vmem>>, vector<8x256xf32>
    %c0_5 = arith.constant 0 : index
    %c0_6 = arith.constant 0 : index
    %15 = vector.load %arg3[%c0_5, %c0_6] : memref<128x256xf32, #tpu.memory_space<vmem>>, vector<128x256xf32>
    %cst_7 = arith.constant dense<0.000000e+00> : vector<8x256xf32>
    %16 = tpu.matmul %13, %15, %cst_7 {dimension_numbers = #tpu.dot_dimension_numbers<[1], [0], [0], [1], [0, 0, 1, 1], [], []>} : vector<8x128xf32>, vector<128x256xf32>, vector<8x256xf32> -> vector<8x256xf32>
    %17 = arith.addf %14, %16 : vector<8x256xf32>
    %c0_8 = arith.constant 0 : index
    %c0_9 = arith.constant 0 : index
    %18 = vector.load %arg8[%c0_8, %c0_9] : memref<8x256xf32, #tpu.memory_space<vmem>>, vector<8x256xf32>
    tpu.vector_store %arg8[%c0_8, %c0_9], %17 {strides = array<i32>} : memref<8x256xf32, #tpu.memory_space<vmem>>, vector<8x256xf32>,
    %c2_i32 = arith.constant 2 : i32
    %19 = arith.cmpi eq, %arg1, %c2_i32 : i32
    %20 = arith.extui %19 : i1 to i32
    %c0_i32_10 = arith.constant 0 : i32
    %21 = arith.cmpi ne, %20, %c0_i32_10 : i32
    scf.if %21 {
      %c0_11 = arith.constant 0 : index
      %c0_12 = arith.constant 0 : index
      %22 = vector.load %arg8[%c0_11, %c0_12] : memref<8x256xf32, #tpu.memory_space<vmem>>, vector<8x256xf32>
      %c0_13 = arith.constant 0 : index
      %c0_14 = arith.constant 0 : index
      %23 = vector.load %arg6[%c0_13, %c0_14] : memref<8x1xf32, #tpu.memory_space<vmem>>, vector<8x1xf32>
      %24 = vector.broadcast %23 : vector<8x1xf32> to vector<8x256xf32>
      %25 = arith.mulf %22, %24 : vector<8x256xf32>
      %c0_15 = arith.constant 0 : index
      %c0_16 = arith.constant 0 : index
      %c0_17 = arith.constant 0 : index
      %26 = vector.load %arg4[%c0_15, %c0_16, %c0_17] : memref<3x256x256xf32, #tpu.memory_space<vmem>>, vector<1x256x256xf32>
      %27 = vector.shape_cast %26 : vector<1x256x256xf32> to vector<256x256xf32>
      %c0_18 = arith.constant 0 : index
      %c0_19 = arith.constant 0 : index
      %28 = vector.load %arg5[%c0_18, %c0_19] : memref<1x768xf32, #tpu.memory_space<vmem>>, vector<1x256xf32>
      %cst_20 = arith.constant dense<0.000000e+00> : vector<8x256xf32>
      %29 = tpu.matmul %25, %27, %cst_20 {dimension_numbers = #tpu.dot_dimension_numbers<[1], [0], [0], [1], [0, 0, 1, 1], [], []>} : vector<8x256xf32>, vector<256x256xf32>, vector<8x256xf32> -> vector<8x256xf32>
      %30 = vector.broadcast %28 : vector<1x256xf32> to vector<8x256xf32>
      %31 = arith.addf %29, %30 : vector<8x256xf32>
      %cst_21 = arith.constant 0.000000e+00 : f32
      %32 = vector.broadcast %cst_21 : f32 to vector<8x256xf32>
      %33 = arith.maximumf %31, %32 : vector<8x256xf32>
      %c1 = arith.constant 1 : index
      %c0_22 = arith.constant 0 : index
      %c0_23 = arith.constant 0 : index
      %34 = vector.load %arg4[%c1, %c0_22, %c0_23] : memref<3x256x256xf32, #tpu.memory_space<vmem>>, vector<1x256x256xf32>
      %35 = vector.shape_cast %34 : vector<1x256x256xf32> to vector<256x256xf32>
      %c0_24 = arith.constant 0 : index
      %c256 = arith.constant 256 : index
      %36 = vector.load %arg5[%c0_24, %c256] : memref<1x768xf32, #tpu.memory_space<vmem>>, vector<1x256xf32>
      %cst_25 = arith.constant dense<0.000000e+00> : vector<8x256xf32>
      %37 = tpu.matmul %33, %35, %cst_25 {dimension_numbers = #tpu.dot_dimension_numbers<[1], [0], [0], [1], [0, 0, 1, 1], [], []>} : vector<8x256xf32>, vector<256x256xf32>, vector<8x256xf32> -> vector<8x256xf32>
      %38 = vector.broadcast %36 : vector<1x256xf32> to vector<8x256xf32>
      %39 = arith.addf %37, %38 : vector<8x256xf32>
      %cst_26 = arith.constant 0.000000e+00 : f32
      %40 = vector.broadcast %cst_26 : f32 to vector<8x256xf32>
      %41 = arith.maximumf %39, %40 : vector<8x256xf32>
      %c2 = arith.constant 2 : index
      %c0_27 = arith.constant 0 : index
      %c0_28 = arith.constant 0 : index
      %42 = vector.load %arg4[%c2, %c0_27, %c0_28] : memref<3x256x256xf32, #tpu.memory_space<vmem>>, vector<1x256x256xf32>
      %43 = vector.shape_cast %42 : vector<1x256x256xf32> to vector<256x256xf32>
      %c0_29 = arith.constant 0 : index
      %c512 = arith.constant 512 : index
      %44 = vector.load %arg5[%c0_29, %c512] : memref<1x768xf32, #tpu.memory_space<vmem>>, vector<1x256xf32>
      %cst_30 = arith.constant dense<0.000000e+00> : vector<8x256xf32>
      %45 = tpu.matmul %41, %43, %cst_30 {dimension_numbers = #tpu.dot_dimension_numbers<[1], [0], [0], [1], [0, 0, 1, 1], [], []>} : vector<8x256xf32>, vector<256x256xf32>, vector<8x256xf32> -> vector<8x256xf32>
      %46 = vector.broadcast %44 : vector<1x256xf32> to vector<8x256xf32>
      %47 = arith.addf %45, %46 : vector<8x256xf32>
      %c0_31 = arith.constant 0 : index
      %c0_32 = arith.constant 0 : index
      %48 = vector.load %arg7[%c0_31, %c0_32] : memref<8x256xf32, #tpu.memory_space<vmem>>, vector<8x256xf32>
      tpu.vector_store %arg7[%c0_31, %c0_32], %47 {strides = array<i32>} : memref<8x256xf32, #tpu.memory_space<vmem>>, vector<8x256xf32>,
    } else {
    }
    return
  }
  func.func @transform_0(%arg0: i32, %arg1: i32) -> (i32, i32) {
    %c0_i32 = arith.constant 0 : i32
    %c0_i32_0 = arith.constant 0 : i32
    return %c0_i32, %arg1 : i32, i32
  }
  func.func @transform_1(%arg0: i32, %arg1: i32) -> (i32, i32) {
    %c0_i32 = arith.constant 0 : i32
    %c0_i32_0 = arith.constant 0 : i32
    return %arg1, %c0_i32 : i32, i32
  }
  func.func @transform_2(%arg0: i32, %arg1: i32) -> (i32, i32, i32) {
    %c0_i32 = arith.constant 0 : i32
    %c0_i32_0 = arith.constant 0 : i32
    %c0_i32_1 = arith.constant 0 : i32
    %c0_i32_2 = arith.constant 0 : i32
    return %c0_i32, %c0_i32_0, %c0_i32_1 : i32, i32, i32
  }
  func.func @transform_3(%arg0: i32, %arg1: i32) -> (i32, i32) {
    %c0_i32 = arith.constant 0 : i32
    %c0_i32_0 = arith.constant 0 : i32
    %c0_i32_1 = arith.constant 0 : i32
    return %c0_i32, %c0_i32_0 : i32, i32
  }
  func.func @transform_4(%arg0: i32, %arg1: i32) -> (i32, i32) {
    %c0_i32 = arith.constant 0 : i32
    %c0_i32_0 = arith.constant 0 : i32
    return %arg0, %c0_i32 : i32, i32
  }
  func.func @transform_5(%arg0: i32, %arg1: i32) -> (i32, i32) {
    %c0_i32 = arith.constant 0 : i32
    %c0_i32_0 = arith.constant 0 : i32
    return %arg0, %c0_i32 : i32, i32
  }
}

</mosaic_0001>

<bundles_post_ra>
// kernel: tpu_custom_call.1
= control target key start
LH: loop header
LB: loop body
LE: loop exit
PB: predicated region body
PF: predicated region fallthrough
CT: control target
= control target key end

     0   :  { %s1642_s0 = inlined_call_operand.vmem [shape: s32[1,384], index: 0, kind: input, shape index: {}]   ;;  %s1643_s1 = inlined_call_operand.hbm [shape: f32[384,256], index: 1, kind: input, shape index: {}]   ;;  %s1644_s2 = inlined_call_operand.hbm [shape: f32[3,256,256], index: 2, kind: input, shape index: {}]   ;;  %s1645_s3 = inlined_call_operand.vmem [shape: f32[1,768], index: 3, kind: input, shape index: {}]   ;;  %s1646_s4 = inlined_call_operand.vmem [shape: f32[16,1], index: 4, kind: input, shape index: {}]   ;;  %s1647_s5 = inlined_call_operand.hbm [shape: f32[16,256], index: 5, kind: output, shape index: {}]  }
   0x1   :  { %1659 = sst [smem:[#allocation18_spill]] %s1644_s2 }
   0x2   :  { %1660 = sst [smem:[#allocation19_spill]] %s1645_s3 }
   0x3   :  { %1661 = sst [smem:[#allocation20_spill]] %s1647_s5 }
   0x4   :  { %10 = vsyncpa [#allocation4], 0 }
   0x5   :  { %12 = vsyncpa [#allocation4 + $0x1], 0 }
   0x6   :  { %13 = vsyncpa [#allocation7], 0 }
   0x7   :  { %14 = vsyncpa [#allocation5], 0 }
   0x8   :  { %16 = vsyncpa [#allocation5 + $0x1], 0  ;;  %s1372_s18 = smov 0   ;;  %s1374_s19 = smov 0  }
   0x9   :  { %s1376_s20 = smov 0   ;;  %s1378_s21 = smov 0  }
   0xa   :  { %s1380_s22 = smov 0   ;;  %s1382_s23 = smov 0  }
   0xb   :  { %s1384_s24 = smov 0   ;;  %s1386_s25 = smov 0  }
   0xc   :  { %s1388_s26 = smov 0   ;;  %s1390_s27 = smov 0  }
   0xd   :  { %s1392_s28 = smov 0  }
   0xe LB: > { %1662 = sst [smem:[#allocation12_spill]] %s1294_s18  ;;  %s1001_s29 = sadd.s32 4294967295, %s1334_s28   ;;  %s1334_s28 = sphi %s1392_s28, %s22_s28   ;;  %s1330_s27 = sphi %s1390_s27, %s1684_s27   ;;  %s1326_s26 = sphi %s1388_s26, %s1692_s26   ;;  %s1322_s25 = sphi %s1386_s25, %s1682_s25   ;;  %s1318_s24 = sphi %s1384_s24, %s1691_s24   ;;  %s1314_s23 = sphi %s1382_s23, %s1690_s23   ;;  %s1310_s22 = sphi %s1380_s22, %s1689_s22   ;;  %s1306_s21 = sphi %s1378_s21, %s1688_s21   ;;  %s1302_s20 = sphi %s1376_s20, %s1687_s20   ;;  %s1298_s19 = sphi %s1374_s19, %s1686_s19   ;;  %s1294_s18 = sphi %s1372_s18, %s1685_s18  }
   0xf   : > { %1663 = sst [smem:[#allocation13_spill]] %s1330_s27  ;;  %s1002_s30 = sadd.s32 4294967294, %s1334_s28  }
  0x10   : > { %p80_p0 = scmp.ne.s32.totalorder %s1310_s22, %s1306_s21  ;;  %p1428_p1 = scmp.eq.s32.totalorder %s1001_s29, 0 }
  0x11   : > { %p171_p2 = scmp.ne.s32.totalorder %s1302_s20, %s1298_s19  ;;  %p172_p4 = scmp.eq.s32.totalorder %s1001_s29, 5 }
  0x12   : > { %p1436_p3 = por %p1428_p1, %p80_p0  ;;  %p177_p5 = scmp.ne.s32.totalorder %s1298_s19, %s1294_s18 }
  0x13   : > { %p178_p6 = scmp.eq.s32.totalorder %s1002_s30, 5  ;;  %p1442_p7 = por %p172_p4, %p171_p2 }
  0x14   : > { %p1003_p8 = scmp.ge.s32.totalorder %s1334_s28, 1  ;;  %p185_p10 = scmp.lt.s32.totalorder %s1334_s28, 7 }
  0x15   : > { %s1666_s8 = scalar_select %p1442_p7, 1, 0 }
  0x16   : > { %p1447_p9 = por %p178_p6, %p177_p5  ;;  %s1670_s2 = sld [smem:[#allocation18_spill]] }
  0x17   : > { %1667 = sst [smem:[#allocation14_spill]] %s1666_s8  ;;  %p1455_p11 = pnand %p1003_p8, %p185_p10 }
  0x18   : > { %s1668_s9 = scalar_select %p1447_p9, 1, 0 }
  0x19   : > { %p1036_p12 = pneg %p1455_p11  ;;  %s1336_s14 = smov [#allocation6]  }
  0x1a   : > { %1669 = sst [smem:[#allocation15_spill]] %s1668_s9  ;;  %s198_s15 = sshll.u32 %s1336_s14, 4  ;;  %s199_s15 = int_to_ptr.vmem [resolvable:$true] %s198_s15 }
  0x1b   : > { %p1037_p13 = pnand %p1036_p12, %p1428_p1  ;;  %s1648_s16 = smov 256  }
  0x1c   : > { %s196_s12 = sshll.u32 %s1670_s2, 4  ;;  %s1649_s17 = smov 16   ;;  %s197_s12 = int_to_ptr.hbm [resolvable:$true] %s196_s12 }
  0x1d   : > { %1039 = dma.hbm_to_vmem [thread:$0]  (!%p1037_p13), %s197_s12, 24576, %s199_s15, [#allocation7], %s1648_s16, %s1648_s16, %s1649_s17  }
  0x1e   : > { %s31_s21 = sadd.s32 1, %s1326_s26  ;;  %s34_s29 = sadd.s32 1, %s1330_s27 }
  0x1f   : > { %p32_p0 = scmp.ge.s32.totalorder %s31_s21, 3  ;;  %s67_s30 = sadd.s32 1, %s1314_s23 }
  0x20   : > { %p74_p2 = scmp.ne.s32.totalorder %s1314_s23, %s1310_s22  ;;  %p75_p4 = scmp.eq.s32.totalorder %s1334_s28, 0 }
  0x21   : > { %s1694_s21 = smov (%p32_p0, %s31_s21), 0  ;;  %s1696_s29 = smov (!%p32_p0, %s34_s29), %s1330_s27 }
  0x22   : > { %1672 = sst [smem:[#allocation16_spill]] %s1694_s21  ;;  %s64_s10 = ssub.s32 %s1326_s26, %s1694_s21 }
  0x23   : > { %p36_p5 = scmp.ge.s32.totalorder %s1696_s29, 2  ;;  %p65_p6 = scmp.eq.s32.totalorder %s64_s10, 0 }
  0x24   : > { %s161_s11 = sadd.s32 1, %s1302_s20  ;;  %p1478_p8 = por %p75_p4, %p74_p2 }
  0x25   : > { %s1698_s29 = smov (%p36_p5, %s1696_s29), 0  ;;  %s221_s16 = sand.u32 1, %s1314_s23  }
  0x26   : > { %1674 = sst [smem:[#allocation17_spill]] %s1698_s29  ;;  %s158_s15 = ssub.s32 %s1330_s27, %s1698_s29 }
  0x27   : > { %s1485_s14 = scalar_select %p65_p6, %s1314_s23, %s67_s30  }
  0x28   : > { %p159_p10 = scmp.eq.s32.totalorder %s158_s15, 0  ;;  %p1049_p12 = scmp.lt.s32.totalorder %s1334_s28, 6 }
  0x29   : > { %s1006_s17 = sshll.u32 %s221_s16, 8  ;;  %s1026_s2 = sshll.u32 %s1326_s26, 8 }
  0x2a   : > { %s1493_s21 = scalar_select %p159_p10, %s1302_s20, %s161_s11  }
  0x2b   : > { %s231_s18 = scalar_lea.hbm %s1643_s1, %s1026_s2  ;;  %s225_s8 = scalar_lea.vmem [#allocation3], %s1006_s17 }
  0x2c   : > { %s232_s5 = sshll.u32 %s231_s18, 4  ;;  %s234_s3 = sshll.u32 %s225_s8, 4  ;;  %s233_s5 = int_to_ptr.hbm [resolvable:$true] %s232_s5  ;;  %s235_s3 = int_to_ptr.vmem [resolvable:$true] %s234_s3 }
  0x2d   : > { %p1041_p13 = pnand %p1049_p12, %p1478_p8  ;;  %s222_s30 = scalar_lea.sflag [#allocation4], %s221_s16 }
  0x2e   : > { %s1675_s29 = smov 16   ;;  %s1676_s27 = smov 256  }
  0x2f   : > { %1043 = dma.hbm_to_vmem [thread:$0]  (!%p1041_p13), %s233_s5, 4096, %s235_s3, %s222_s30, %s1676_s27, %s1676_s27, %s1675_s29  }
  0x30   : > { %253 = sbr.rel (%p1455_p11) target bundleno = 782 (0x30e), region = 40  ;;  %s255_s11 = sand.u32 (!%p1455_p11), 1, %s1310_s22  }
  0x31   : > { %s1011_s9 = sshll.u32 (!%p1455_p11), %s255_s11, 8  ;;  %s256_s2 = scalar_lea.sflag (!%p1455_p11), [#allocation4], %s255_s11 }
  0x32   : > { %s1506_s18 = scalar_lea.vmem (!%p1455_p11), [#allocation3], %s1011_s9 }
  0x35   : > { %1281 = dma.done.wait (%p1436_p3), %s256_s2, 4096  }
  0x36   : > { %1283 = vsyncadd (%p1436_p3), %s256_s2, 4294963200 }
  0x37   : > { %1285 = dma.done.wait (%p1428_p1), [#allocation7], 24576  }
  0x38   : > { %1287 = vsyncadd (%p1428_p1), [#allocation7], 4294942720  ;;  %s296_s3 = sand.u32 1, %s1298_s19   ;;  %p299_p11 = scmp.lt.s32.totalorder %s1318_s24, 2 }
  0x39   : > { %s1013_s5 = sshll.u32 %s296_s3, 4  ;;  %p303_p0 = scmp.lt.s32.totalorder %s1322_s25, 1 }
  0x3a   : > { %s1522_s27 = scalar_select %p299_p11, %s1318_s24, 2 }
  0x3b   : > { %s304_s7 = scalar_select %p303_p0, %s1322_s25, 1 }
  0x3c   : > { %s301_s6 = scalar_lea.vmem %s1642_s0, %s1522_s27  ;;  %s1534_s15 = scalar_lea.vmem [#allocation8], %s1013_s5 }
  0x3d   : > { %s1014_s16 = sshll.u32 %s304_s7, 3  ;;  %p1015_p1 = scmp.ne.s32.totalorder %s1318_s24, 0 }
  0x3e   : > { %s1532_s12 = scalar_lea.vmem %s1646_s4, %s1014_s16 }
  0x3f   : > { %310 = sbr.rel (%p1015_p1) target bundleno = 71 (0x47), region = 52 }
  0x44   : > { %v1339_v0 = vmov 0.0  }
  0x45   : > { %311 = vst [vmem:[#allocation2] sm:$0xff] %v1339_v0 }
  0x46   : > { %312 = vst [vmem:[#allocation2 + $0x8] sm:$0xff] %v1339_v0 }
  0x47 PF: > { %v354_v1 = vld [vmem:[%s1506_s18 + $0xf0] sm:$0xff]  ;;  %v355_v2 = vld [vmem:[%s1506_s18 + $0xf8] sm:$0xff]  ;;  %v352_v3 = vld [vmem:[%s1506_s18 + $0xe0] sm:$0xff]  ;;  %v314_v21 = vlaneseq  ;;  %s1016_s10 = sshll.u32 %s1322_s25, 3  ;;  %v1340_v38 = vmov 1.0   ;;  %p1019_p3 = scmp.ne.s32.totalorder %s1318_s24, 2 }
  0x48   : > { %356 = vmatpush.msra.mxu0 %v354_v1  ;;  %376 = vmatpush.msra.mxu1 %v355_v2  ;;  %v353_v4 = vld [vmem:[%s1506_s18 + $0xe8] sm:$0xff]  ;;  %v350_v5 = vld [vmem:[%s1506_s18 + $0xd0] sm:$0xff]  ;;  %v351_v6 = vld [vmem:[%s1506_s18 + $0xd8] sm:$0xff]  ;;  %v316_v29 = vstv %s1016_s10  ;;  %s1677_s2 = sld [smem:[#allocation19_spill]] (!%p1019_p3) }
  0x49   : > { %v348_v7 = vld [vmem:[%s1506_s18 + $0xc0] sm:$0xff]  ;;  %v349_v8 = vld [vmem:[%s1506_s18 + $0xc8] sm:$0xff]  ;;  %v346_v9 = vld [vmem:[%s1506_s18 + $0xb0] sm:$0xff]  ;;  %v315_v26 = vshrl.u32 %v314_v21, 7 }
  0x4a   : > { %357 = vmatpush.msra.mxu0 %v352_v3  ;;  %377 = vmatpush.msra.mxu1 %v353_v4  ;;  %v347_v10 = vld [vmem:[%s1506_s18 + $0xb8] sm:$0xff]  ;;  %v344_v11 = vld [vmem:[%s1506_s18 + $0xa0] sm:$0xff]  ;;  %v345_v12 = vld [vmem:[%s1506_s18 + $0xa8] sm:$0xff] }
  0x4b   : > { %v342_v13 = vld [vmem:[%s1506_s18 + $0x90] sm:$0xff]  ;;  %v343_v14 = vld [vmem:[%s1506_s18 + $0x98] sm:$0xff]  ;;  %v340_v15 = vld [vmem:[%s1506_s18 + $0x80] sm:$0xff]  ;;  %v317_v32 = vadd.s32 %v316_v29, %v315_v26 }
  0x4c   : > { %358 = vmatpush.msra.mxu0 %v350_v5  ;;  %378 = vmatpush.msra.mxu1 %v351_v6  ;;  %v341_v16 = vld [vmem:[%s1506_s18 + $0x88] sm:$0xff]  ;;  %v338_v17 = vld [vmem:[%s1506_s18 + $0x70] sm:$0xff]  ;;  %v339_v18 = vld [vmem:[%s1506_s18 + $0x78] sm:$0xff] }
  0x4d   : > { %v336_v19 = vld [vmem:[%s1506_s18 + $0x60] sm:$0xff]  ;;  %v337_v20 = vld [vmem:[%s1506_s18 + $0x68] sm:$0xff]  ;;  %v334_v22 = vld [vmem:[%s1506_s18 + $0x50] sm:$0xff] }
  0x4e   : > { %359 = vmatpush.msra.mxu0 %v348_v7  ;;  %379 = vmatpush.msra.mxu1 %v349_v8  ;;  %v335_v23 = vld [vmem:[%s1506_s18 + $0x58] sm:$0xff]  ;;  %v332_v24 = vld [vmem:[%s1506_s18 + $0x40] sm:$0xff]  ;;  %v333_v25 = vld [vmem:[%s1506_s18 + $0x48] sm:$0xff] }
  0x4f   : > { %v330_v27 = vld [vmem:[%s1506_s18 + $0x30] sm:$0xff]  ;;  %v331_v28 = vld [vmem:[%s1506_s18 + $0x38] sm:$0xff]  ;;  %v328_v30 = vld [vmem:[%s1506_s18 + $0x20] sm:$0xff] }
  0x50   : > { %360 = vmatpush.msra.mxu0 %v346_v9  ;;  %380 = vmatpush.msra.mxu1 %v347_v10  ;;  %v329_v31 = vld [vmem:[%s1506_s18 + $0x28] sm:$0xff]  ;;  %v1146_v33 = vld [vmem:[%s301_s6] ss:$0 sm:$0xff]  ;;  %v327_v35 = vld [vmem:[%s1506_s18 + $0x18] sm:$0xff] }
  0x51   : > { %v326_v34 = vld [vmem:[%s1506_s18 + $0x10] sm:$0xff]  ;;  %v324_v36 = vld [vmem:[%s1506_s18] sm:$0xff]  ;;  %v325_v37 = vld [vmem:[%s1506_s18 + $0x8] sm:$0xff]  ;;  %vm320_vm0 = vcmp.eq.s32.totalorder %v1146_v33, %v317_v32 }
  0x52   : > { %361 = vmatpush.msra.mxu0 %v344_v11  ;;  %381 = vmatpush.msra.mxu1 %v345_v12  ;;  %v322_v39 = vld [vmem:[#allocation2] sm:$0xff]  ;;  %v323_v40 = vld [vmem:[#allocation2 + $0x8] sm:$0xff] }
  0x54   : > { %362 = vmatpush.msra.mxu0 %v342_v13  ;;  %382 = vmatpush.msra.mxu1 %v343_v14 }
  0x56   : > { %363 = vmatpush.msra.mxu0 %v340_v15  ;;  %383 = vmatpush.msra.mxu1 %v341_v16 }
  0x58   : > { %364 = vmatpush.msra.mxu0 %v338_v17  ;;  %384 = vmatpush.msra.mxu1 %v339_v18 }
  0x5a   : > { %365 = vmatpush.msra.mxu0 %v336_v19  ;;  %385 = vmatpush.msra.mxu1 %v337_v20 }
  0x5c   : > { %366 = vmatpush.msra.mxu0 %v334_v22  ;;  %386 = vmatpush.msra.mxu1 %v335_v23 }
  0x5e   : > { %367 = vmatpush.msra.mxu0 %v332_v24  ;;  %387 = vmatpush.msra.mxu1 %v333_v25 }
  0x60   : > { %368 = vmatpush.msra.mxu0 %v330_v27  ;;  %388 = vmatpush.msra.mxu1 %v331_v28 }
  0x62   : > { %369 = vmatpush.msra.mxu0 %v328_v30  ;;  %389 = vmatpush.msra.mxu1 %v329_v31 }
  0x64   : > { %370 = vmatpush.msra.mxu0 %v326_v34  ;;  %390 = vmatpush.msra.mxu1 %v327_v35 }
  0x66   : > { %371 = vmatpush.msra.mxu0 %v324_v36  ;;  %391 = vmatpush.msra.mxu1 %v325_v37 }
  0x67   : > { %1017 = vmatmul.msk.f32.vlgmr.msra.gmra.mxu0 %vm320_vm0, %v1340_v38  ;;  %1018 = vmatmul.msk.f32.vlgmr.msra.gmra.mxu1 %vm320_vm0, %v1340_v38 }
  0xe4   : > { %v373_v41 = vpop.f32.mrf.mxu0  ;;  %v393_v42 = vpop.f32.mrf.mxu1  ;;  %403 = sbr.rel (%p1019_p3) target bundleno = 762 (0x2fa), region = 56 }
  0xe5   : > { %v396_v43 = vadd.f32 %v373_v41, %v322_v39  ;;  %v397_v44 = vadd.f32 %v393_v42, %v323_v40 }
  0xe7   : > { %398 = vst [vmem:[#allocation2] sm:$0xff] %v396_v43 }
  0xe8   : > { %399 = vst [vmem:[#allocation2 + $0x8] sm:$0xff] %v397_v44 }
  0xe9   : > { %v406_v45 = vld [vmem:[%s1532_s12] sm:$0xff]  ;;  %v1341_v48 = vmov 0   ;;  %v445_v49 = vld [vmem:[#allocation6 + $0xf8] sm:$0xff]  ;;  %v442_v51 = vld [vmem:[#allocation6 + $0xe0] sm:$0xff] }
  0xea   : > { %v444_v46 = vld [vmem:[#allocation6 + $0xf0] sm:$0xff]  ;;  %1147 = vset.pattern.permute.xlu0 %v1341_v48  ;;  %v477_v50 = vld [vmem:[#allocation6 + $0x1f8] sm:$0xff]  ;;  %v474_v52 = vld [vmem:[#allocation6 + $0x1e0] sm:$0xff]  ;;  %524 = vmatpush.msra.mxu2 %v445_v49 }
  0xeb   : > { %v476_v47 = vld [vmem:[#allocation6 + $0x1f0] sm:$0xff]  ;;  %484 = vmatpush.msra.mxu0 %v444_v46  ;;  %409 = vperm.xlu0 %1147, %v406_v45   ;;  %v443_v53 = vld [vmem:[#allocation6 + $0xe8] sm:$0xff]  ;;  %v441_v57 = vld [vmem:[#allocation6 + $0xd8] sm:$0xff] }
  0xec   : > { %504 = vmatpush.msra.mxu1 %v476_v47  ;;  %v475_v54 = vld [vmem:[#allocation6 + $0x1e8] sm:$0xff]  ;;  %544 = vmatpush.msra.mxu3 %v477_v50  ;;  %v440_v55 = vld [vmem:[#allocation6 + $0xd0] sm:$0xff]  ;;  %v473_v58 = vld [vmem:[#allocation6 + $0x1d8] sm:$0xff] }
  0xed   : > { %v472_v56 = vld [vmem:[#allocation6 + $0x1d0] sm:$0xff]  ;;  %485 = vmatpush.msra.mxu0 %v442_v51  ;;  %525 = vmatpush.msra.mxu2 %v443_v53  ;;  %v438_v59 = vld [vmem:[#allocation6 + $0xc0] sm:$0xff]  ;;  %v439_v61 = vld [vmem:[#allocation6 + $0xc8] sm:$0xff] }
  0xee   : > { %505 = vmatpush.msra.mxu1 %v474_v52  ;;  %545 = vmatpush.msra.mxu3 %v475_v54  ;;  %v470_v60 = vld [vmem:[#allocation6 + $0x1c0] sm:$0xff]  ;;  %v471_v62 = vld [vmem:[#allocation6 + $0x1c8] sm:$0xff]  ;;  %v436_v63 = vld [vmem:[#allocation6 + $0xb0] sm:$0xff] }
  0xef   : > { %486 = vmatpush.msra.mxu0 %v440_v55  ;;  %526 = vmatpush.msra.mxu2 %v441_v57  ;;  %v468_v0 = vld [vmem:[#allocation6 + $0x1b0] sm:$0xff]  ;;  %v437_v1 = vld [vmem:[#allocation6 + $0xb8] sm:$0xff]  ;;  %v434_v3 = vld [vmem:[#allocation6 + $0xa0] sm:$0xff] }
  0xf0   : > { %506 = vmatpush.msra.mxu1 %v472_v56  ;;  %546 = vmatpush.msra.mxu3 %v473_v58  ;;  %v469_v2 = vld [vmem:[#allocation6 + $0x1b8] sm:$0xff]  ;;  %v466_v4 = vld [vmem:[#allocation6 + $0x1a0] sm:$0xff]  ;;  %v435_v5 = vld [vmem:[#allocation6 + $0xa8] sm:$0xff] }
  0xf1   : > { %487 = vmatpush.msra.mxu0 %v438_v59  ;;  %527 = vmatpush.msra.mxu2 %v439_v61  ;;  %v467_v6 = vld [vmem:[#allocation6 + $0x1a8] sm:$0xff]  ;;  %v432_v7 = vld [vmem:[#allocation6 + $0x90] sm:$0xff]  ;;  %v433_v9 = vld [vmem:[#allocation6 + $0x98] sm:$0xff] }
  0xf2   : > { %507 = vmatpush.msra.mxu1 %v470_v60  ;;  %547 = vmatpush.msra.mxu3 %v471_v62  ;;  %v464_v8 = vld [vmem:[#allocation6 + $0x190] sm:$0xff]  ;;  %v465_v10 = vld [vmem:[#allocation6 + $0x198] sm:$0xff]  ;;  %v430_v11 = vld [vmem:[#allocation6 + $0x80] sm:$0xff] }
  0xf3   : > { %488 = vmatpush.msra.mxu0 %v436_v63  ;;  %528 = vmatpush.msra.mxu2 %v437_v1  ;;  %v462_v12 = vld [vmem:[#allocation6 + $0x180] sm:$0xff]  ;;  %v431_v13 = vld [vmem:[#allocation6 + $0x88] sm:$0xff]  ;;  %v428_v15 = vld [vmem:[#allocation6 + $0x70] sm:$0xff] }
  0xf4   : > { %508 = vmatpush.msra.mxu1 %v468_v0  ;;  %548 = vmatpush.msra.mxu3 %v469_v2  ;;  %v463_v14 = vld [vmem:[#allocation6 + $0x188] sm:$0xff]  ;;  %v460_v16 = vld [vmem:[#allocation6 + $0x170] sm:$0xff]  ;;  %v429_v17 = vld [vmem:[#allocation6 + $0x78] sm:$0xff] }
  0xf5   : > { %489 = vmatpush.msra.mxu0 %v434_v3  ;;  %529 = vmatpush.msra.mxu2 %v435_v5  ;;  %v461_v18 = vld [vmem:[#allocation6 + $0x178] sm:$0xff]  ;;  %v426_v19 = vld [vmem:[#allocation6 + $0x60] sm:$0xff]  ;;  %v427_v21 = vld [vmem:[#allocation6 + $0x68] sm:$0xff] }
  0xf6   : > { %509 = vmatpush.msra.mxu1 %v466_v4  ;;  %549 = vmatpush.msra.mxu3 %v467_v6  ;;  %v458_v20 = vld [vmem:[#allocation6 + $0x160] sm:$0xff]  ;;  %v459_v22 = vld [vmem:[#allocation6 + $0x168] sm:$0xff]  ;;  %v424_v23 = vld [vmem:[#allocation6 + $0x50] sm:$0xff] }
  0xf7   : > { %490 = vmatpush.msra.mxu0 %v432_v7  ;;  %530 = vmatpush.msra.mxu2 %v433_v9  ;;  %v456_v24 = vld [vmem:[#allocation6 + $0x150] sm:$0xff]  ;;  %v425_v25 = vld [vmem:[#allocation6 + $0x58] sm:$0xff]  ;;  %v422_v27 = vld [vmem:[#allocation6 + $0x40] sm:$0xff] }
  0xf8   : > { %510 = vmatpush.msra.mxu1 %v464_v8  ;;  %550 = vmatpush.msra.mxu3 %v465_v10  ;;  %v457_v26 = vld [vmem:[#allocation6 + $0x158] sm:$0xff]  ;;  %v454_v28 = vld [vmem:[#allocation6 + $0x140] sm:$0xff]  ;;  %v423_v29 = vld [vmem:[#allocation6 + $0x48] sm:$0xff] }
  0xf9   : > { %491 = vmatpush.msra.mxu0 %v430_v11  ;;  %531 = vmatpush.msra.mxu2 %v431_v13  ;;  %v455_v30 = vld [vmem:[#allocation6 + $0x148] sm:$0xff]  ;;  %v420_v31 = vld [vmem:[#allocation6 + $0x30] sm:$0xff]  ;;  %v421_v33 = vld [vmem:[#allocation6 + $0x38] sm:$0xff] }
  0xfa   : > { %511 = vmatpush.msra.mxu1 %v462_v12  ;;  %551 = vmatpush.msra.mxu3 %v463_v14  ;;  %v452_v32 = vld [vmem:[#allocation6 + $0x130] sm:$0xff]  ;;  %v453_v34 = vld [vmem:[#allocation6 + $0x138] sm:$0xff]  ;;  %v418_v35 = vld [vmem:[#allocation6 + $0x20] sm:$0xff] }
  0xfb   : > { %492 = vmatpush.msra.mxu0 %v428_v15  ;;  %532 = vmatpush.msra.mxu2 %v429_v17  ;;  %v450_v36 = vld [vmem:[#allocation6 + $0x120] sm:$0xff]  ;;  %v419_v37 = vld [vmem:[#allocation6 + $0x28] sm:$0xff]  ;;  %v416_v39 = vld [vmem:[#allocation6 + $0x10] sm:$0xff] }
  0xfc   : > { %512 = vmatpush.msra.mxu1 %v460_v16  ;;  %552 = vmatpush.msra.mxu3 %v461_v18  ;;  %v451_v38 = vld [vmem:[#allocation6 + $0x128] sm:$0xff]  ;;  %v448_v40 = vld [vmem:[#allocation6 + $0x110] sm:$0xff]  ;;  %v417_v41 = vld [vmem:[#allocation6 + $0x18] sm:$0xff] }
  0xfd   : > { %493 = vmatpush.msra.mxu0 %v426_v19  ;;  %533 = vmatpush.msra.mxu2 %v427_v21  ;;  %v449_v42 = vld [vmem:[#allocation6 + $0x118] sm:$0xff]  ;;  %v414_v43 = vld [vmem:[#allocation6] sm:$0xff]  ;;  %v415_v45 = vld [vmem:[#allocation6 + $0x8] sm:$0xff] }
  0xfe   : > { %513 = vmatpush.msra.mxu1 %v458_v20  ;;  %553 = vmatpush.msra.mxu3 %v459_v22  ;;  %v446_v44 = vld [vmem:[#allocation6 + $0x100] sm:$0xff]  ;;  %v447_v46 = vld [vmem:[#allocation6 + $0x108] sm:$0xff]  ;;  %v597_v47 = vld [vmem:[#allocation6 + $0x2f0] sm:$0xff] }
  0xff   : > { %494 = vmatpush.msra.mxu0 %v424_v23  ;;  %534 = vmatpush.msra.mxu2 %v425_v25  ;;  %v598_v48 = vld [vmem:[#allocation6 + $0x2f8] sm:$0xff]  ;;  %v595_v49 = vld [vmem:[#allocation6 + $0x2e0] sm:$0xff]  ;;  %v596_v50 = vld [vmem:[#allocation6 + $0x2e8] sm:$0xff] }
 0x100   : > { %514 = vmatpush.msra.mxu1 %v456_v24  ;;  %554 = vmatpush.msra.mxu3 %v457_v26  ;;  %v593_v51 = vld [vmem:[#allocation6 + $0x2d0] sm:$0xff]  ;;  %v594_v52 = vld [vmem:[#allocation6 + $0x2d8] sm:$0xff]  ;;  %v627_v55 = vld [vmem:[#allocation6 + $0x3e0] sm:$0xff] }
 0x101   : > { %495 = vmatpush.msra.mxu0 %v422_v27  ;;  %535 = vmatpush.msra.mxu2 %v423_v29  ;;  %v629_v53 = vld [vmem:[#allocation6 + $0x3f0] sm:$0xff]  ;;  %v630_v54 = vld [vmem:[#allocation6 + $0x3f8] sm:$0xff]  ;;  %v591_v56 = vld [vmem:[#allocation6 + $0x2c0] sm:$0xff] }
 0x102   : > { %515 = vmatpush.msra.mxu1 %v454_v28  ;;  %555 = vmatpush.msra.mxu3 %v455_v30  ;;  %v592_v57 = vld [vmem:[#allocation6 + $0x2c8] sm:$0xff]  ;;  %v625_v59 = vld [vmem:[#allocation6 + $0x3d0] sm:$0xff]  ;;  %v626_v60 = vld [vmem:[#allocation6 + $0x3d8] sm:$0xff] }
 0x103   : > { %496 = vmatpush.msra.mxu0 %v420_v31  ;;  %536 = vmatpush.msra.mxu2 %v421_v33  ;;  %v628_v58 = vld [vmem:[#allocation6 + $0x3e8] sm:$0xff]  ;;  %v589_v61 = vld [vmem:[#allocation6 + $0x2b0] sm:$0xff]  ;;  %v590_v62 = vld [vmem:[#allocation6 + $0x2b8] sm:$0xff] }
 0x104   : > { %516 = vmatpush.msra.mxu1 %v452_v32  ;;  %556 = vmatpush.msra.mxu3 %v453_v34  ;;  %v623_v63 = vld [vmem:[#allocation6 + $0x3c0] sm:$0xff]  ;;  %v624_v0 = vld [vmem:[#allocation6 + $0x3c8] sm:$0xff]  ;;  %v621_v3 = vld [vmem:[#allocation6 + $0x3b0] sm:$0xff] }
 0x105   : > { %497 = vmatpush.msra.mxu0 %v418_v35  ;;  %537 = vmatpush.msra.mxu2 %v419_v37  ;;  %v587_v1 = vld [vmem:[#allocation6 + $0x2a0] sm:$0xff]  ;;  %v588_v2 = vld [vmem:[#allocation6 + $0x2a8] sm:$0xff]  ;;  %v622_v4 = vld [vmem:[#allocation6 + $0x3b8] sm:$0xff] }
 0x106   : > { %517 = vmatpush.msra.mxu1 %v450_v36  ;;  %557 = vmatpush.msra.mxu3 %v451_v38  ;;  %v585_v5 = vld [vmem:[#allocation6 + $0x290] sm:$0xff]  ;;  %v586_v6 = vld [vmem:[#allocation6 + $0x298] sm:$0xff]  ;;  %v619_v7 = vld [vmem:[#allocation6 + $0x3a0] sm:$0xff] }
 0x107   : > { %498 = vmatpush.msra.mxu0 %v416_v39  ;;  %538 = vmatpush.msra.mxu2 %v417_v41  ;;  %v620_v8 = vld [vmem:[#allocation6 + $0x3a8] sm:$0xff]  ;;  %v583_v9 = vld [vmem:[#allocation6 + $0x280] sm:$0xff]  ;;  %v617_v11 = vld [vmem:[#allocation6 + $0x390] sm:$0xff] }
 0x108   : > { %518 = vmatpush.msra.mxu1 %v448_v40  ;;  %558 = vmatpush.msra.mxu3 %v449_v42  ;;  %v584_v10 = vld [vmem:[#allocation6 + $0x288] sm:$0xff]  ;;  %v618_v12 = vld [vmem:[#allocation6 + $0x398] sm:$0xff]  ;;  %v581_v13 = vld [vmem:[#allocation6 + $0x270] sm:$0xff] }
 0x109   : > { %499 = vmatpush.msra.mxu0 %v414_v43  ;;  %539 = vmatpush.msra.mxu2 %v415_v45  ;;  %v582_v14 = vld [vmem:[#allocation6 + $0x278] sm:$0xff]  ;;  %v615_v15 = vld [vmem:[#allocation6 + $0x380] sm:$0xff]  ;;  %v616_v16 = vld [vmem:[#allocation6 + $0x388] sm:$0xff] }
 0x10a   : > { %519 = vmatpush.msra.mxu1 %v446_v44  ;;  %559 = vmatpush.msra.mxu3 %v447_v46  ;;  %v579_v17 = vld [vmem:[#allocation6 + $0x260] sm:$0xff]  ;;  %v580_v18 = vld [vmem:[#allocation6 + $0x268] sm:$0xff]  ;;  %v613_v19 = vld [vmem:[#allocation6 + $0x370] sm:$0xff] }
 0x10b   : > { %637 = vmatpush.msrb.mxu0 %v597_v47  ;;  %677 = vmatpush.msrb.mxu2 %v598_v48  ;;  %v614_v20 = vld [vmem:[#allocation6 + $0x378] sm:$0xff]  ;;  %v577_v21 = vld [vmem:[#allocation6 + $0x250] sm:$0xff]  ;;  %v575_v23 = vld [vmem:[#allocation6 + $0x240] sm:$0xff] }
 0x10c   : > { %657 = vmatpush.msrb.mxu1 %v629_v53  ;;  %697 = vmatpush.msrb.mxu3 %v630_v54  ;;  %v578_v22 = vld [vmem:[#allocation6 + $0x258] sm:$0xff]  ;;  %v576_v24 = vld [vmem:[#allocation6 + $0x248] sm:$0xff]  ;;  %v404_v25 = vld [vmem:[#allocation2] sm:$0xff] }
 0x10d   : > { %638 = vmatpush.msrb.mxu0 %v595_v49  ;;  %678 = vmatpush.msrb.mxu2 %v596_v50  ;;  %v405_v26 = vld [vmem:[#allocation2 + $0x8] sm:$0xff]  ;;  %v573_v30 = vld [vmem:[#allocation6 + $0x230] sm:$0xff]  ;;  %v611_v31 = vld [vmem:[#allocation6 + $0x360] sm:$0xff] }
 0x10e   : > { %658 = vmatpush.msrb.mxu1 %v627_v55  ;;  %698 = vmatpush.msrb.mxu3 %v628_v58  ;;  %v574_v32 = vld [vmem:[#allocation6 + $0x238] sm:$0xff]  ;;  %v612_v33 = vld [vmem:[#allocation6 + $0x368] sm:$0xff]  ;;  %v571_v34 = vld [vmem:[#allocation6 + $0x220] sm:$0xff] }
 0x10f   : > { %639 = vmatpush.msrb.mxu0 %v593_v51  ;;  %679 = vmatpush.msrb.mxu2 %v594_v52  ;;  %v609_v35 = vld [vmem:[#allocation6 + $0x350] sm:$0xff]  ;;  %v572_v36 = vld [vmem:[#allocation6 + $0x228] sm:$0xff]  ;;  %v610_v37 = vld [vmem:[#allocation6 + $0x358] sm:$0xff] }
 0x110   : > { %659 = vmatpush.msrb.mxu1 %v625_v59  ;;  %699 = vmatpush.msrb.mxu3 %v626_v60  ;;  %v569_v38 = vld [vmem:[#allocation6 + $0x210] sm:$0xff]  ;;  %v607_v39 = vld [vmem:[#allocation6 + $0x340] sm:$0xff]  ;;  %v570_v40 = vld [vmem:[#allocation6 + $0x218] sm:$0xff] }
 0x111   : > { %640 = vmatpush.msrb.mxu0 %v591_v56  ;;  %680 = vmatpush.msrb.mxu2 %v592_v57  ;;  %v608_v41 = vld [vmem:[#allocation6 + $0x348] sm:$0xff]  ;;  %v567_v42 = vld [vmem:[#allocation6 + $0x200] sm:$0xff]  ;;  %v605_v43 = vld [vmem:[#allocation6 + $0x330] sm:$0xff] }
 0x112   : > { %660 = vmatpush.msrb.mxu1 %v623_v63  ;;  %700 = vmatpush.msrb.mxu3 %v624_v0  ;;  %v568_v44 = vld [vmem:[#allocation6 + $0x208] sm:$0xff]  ;;  %v606_v45 = vld [vmem:[#allocation6 + $0x338] sm:$0xff]  ;;  %v603_v46 = vld [vmem:[#allocation6 + $0x320] sm:$0xff] }
 0x113   : > { %641 = vmatpush.msrb.mxu0 %v589_v61  ;;  %681 = vmatpush.msrb.mxu2 %v590_v62  ;;  %v604_v47 = vld [vmem:[#allocation6 + $0x328] sm:$0xff]  ;;  %v601_v48 = vld [vmem:[#allocation6 + $0x310] sm:$0xff]  ;;  %v602_v49 = vld [vmem:[#allocation6 + $0x318] sm:$0xff] }
 0x114   : > { %661 = vmatpush.msrb.mxu1 %v621_v3  ;;  %701 = vmatpush.msrb.mxu3 %v622_v4  ;;  %v599_v50 = vld [vmem:[#allocation6 + $0x300] sm:$0xff]  ;;  %v600_v51 = vld [vmem:[#allocation6 + $0x308] sm:$0xff]  ;;  %v750_v52 = vld [vmem:[#allocation6 + $0x4f0] sm:$0xff] }
 0x115   : > { %642 = vmatpush.msrb.mxu0 %v587_v1  ;;  %682 = vmatpush.msrb.mxu2 %v588_v2  ;;  %v751_v53 = vld [vmem:[#allocation6 + $0x4f8] sm:$0xff]  ;;  %v748_v54 = vld [vmem:[#allocation6 + $0x4e0] sm:$0xff]  ;;  %v749_v55 = vld [vmem:[#allocation6 + $0x4e8] sm:$0xff] }
 0x116   : > { %662 = vmatpush.msrb.mxu1 %v619_v7  ;;  %702 = vmatpush.msrb.mxu3 %v620_v8  ;;  %v746_v56 = vld [vmem:[#allocation6 + $0x4d0] sm:$0xff]  ;;  %v747_v57 = vld [vmem:[#allocation6 + $0x4d8] sm:$0xff]  ;;  %v780_v60 = vld [vmem:[#allocation6 + $0x5e0] sm:$0xff] }
 0x117   : > { %643 = vmatpush.msrb.mxu0 %v585_v5  ;;  %683 = vmatpush.msrb.mxu2 %v586_v6  ;;  %v782_v58 = vld [vmem:[#allocation6 + $0x5f0] sm:$0xff]  ;;  %v783_v59 = vld [vmem:[#allocation6 + $0x5f8] sm:$0xff]  ;;  %v744_v61 = vld [vmem:[#allocation6 + $0x4c0] sm:$0xff] }
 0x118   : > { %663 = vmatpush.msrb.mxu1 %v617_v11  ;;  %703 = vmatpush.msrb.mxu3 %v618_v12  ;;  %v745_v62 = vld [vmem:[#allocation6 + $0x4c8] sm:$0xff]  ;;  %v778_v0 = vld [vmem:[#allocation6 + $0x5d0] sm:$0xff]  ;;  %v779_v1 = vld [vmem:[#allocation6 + $0x5d8] sm:$0xff] }
 0x119   : > { %644 = vmatpush.msrb.mxu0 %v583_v9  ;;  %684 = vmatpush.msrb.mxu2 %v584_v10  ;;  %v781_v63 = vld [vmem:[#allocation6 + $0x5e8] sm:$0xff]  ;;  %v742_v2 = vld [vmem:[#allocation6 + $0x4b0] sm:$0xff]  ;;  %v743_v3 = vld [vmem:[#allocation6 + $0x4b8] sm:$0xff] }
 0x11a   : > { %664 = vmatpush.msrb.mxu1 %v615_v15  ;;  %704 = vmatpush.msrb.mxu3 %v616_v16  ;;  %v776_v4 = vld [vmem:[#allocation6 + $0x5c0] sm:$0xff]  ;;  %v777_v5 = vld [vmem:[#allocation6 + $0x5c8] sm:$0xff]  ;;  %v774_v8 = vld [vmem:[#allocation6 + $0x5b0] sm:$0xff] }
 0x11b   : > { %645 = vmatpush.msrb.mxu0 %v581_v13  ;;  %685 = vmatpush.msrb.mxu2 %v582_v14  ;;  %v740_v6 = vld [vmem:[#allocation6 + $0x4a0] sm:$0xff]  ;;  %v741_v7 = vld [vmem:[#allocation6 + $0x4a8] sm:$0xff]  ;;  %v775_v9 = vld [vmem:[#allocation6 + $0x5b8] sm:$0xff] }
 0x11c   : > { %665 = vmatpush.msrb.mxu1 %v613_v19  ;;  %705 = vmatpush.msrb.mxu3 %v614_v20  ;;  %v738_v10 = vld [vmem:[#allocation6 + $0x490] sm:$0xff]  ;;  %v739_v11 = vld [vmem:[#allocation6 + $0x498] sm:$0xff]  ;;  %v772_v12 = vld [vmem:[#allocation6 + $0x5a0] sm:$0xff] }
 0x11d   : > { %646 = vmatpush.msrb.mxu0 %v579_v17  ;;  %686 = vmatpush.msrb.mxu2 %v580_v18  ;;  %v773_v13 = vld [vmem:[#allocation6 + $0x5a8] sm:$0xff]  ;;  %v478_v14 = vld [vmem:[%s1677_s2] sm:$0x3]  ;;  %v736_v15 = vld [vmem:[#allocation6 + $0x480] sm:$0xff] }
 0x11e   : > { %666 = vmatpush.msrb.mxu1 %v611_v31  ;;  %706 = vmatpush.msrb.mxu3 %v612_v33  ;;  %v737_v16 = vld [vmem:[#allocation6 + $0x488] sm:$0xff]  ;;  %v770_v17 = vld [vmem:[#allocation6 + $0x590] sm:$0xff]  ;;  %v771_v18 = vld [vmem:[#allocation6 + $0x598] sm:$0xff] }
 0x11f   : > { %647 = vmatpush.msrb.mxu0 %v577_v21  ;;  %687 = vmatpush.msrb.mxu2 %v578_v22  ;;  %v734_v19 = vld [vmem:[#allocation6 + $0x470] sm:$0xff]  ;;  %v735_v20 = vld [vmem:[#allocation6 + $0x478] sm:$0xff]  ;;  %v480_v21 = vperm.slane %v478_v14, 0  ;;  %v732_v22 = vld [vmem:[#allocation6 + $0x460] sm:$0xff] }
 0x120   : > { %667 = vmatpush.msrb.mxu1 %v609_v35  ;;  %707 = vmatpush.msrb.mxu3 %v610_v37  ;;  %v730_v35 = vld [vmem:[#allocation6 + $0x450] sm:$0xff]  ;;  %v731_v37 = vld [vmem:[#allocation6 + $0x458] sm:$0xff] }
 0x121   : > { %648 = vmatpush.msrb.mxu0 %v575_v23  ;;  %688 = vmatpush.msrb.mxu2 %v576_v24  ;;  %v733_v23 = vld [vmem:[#allocation6 + $0x468] sm:$0xff] }
 0x122   : > { %668 = vmatpush.msrb.mxu1 %v607_v39  ;;  %708 = vmatpush.msrb.mxu3 %v608_v41  ;;  %v728_v39 = vld [vmem:[#allocation6 + $0x440] sm:$0xff]  ;;  %v729_v41 = vld [vmem:[#allocation6 + $0x448] sm:$0xff] }
 0x123   : > { %649 = vmatpush.msrb.mxu0 %v573_v30  ;;  %689 = vmatpush.msrb.mxu2 %v574_v32 }
 0x124   : > { %669 = vmatpush.msrb.mxu1 %v605_v43  ;;  %709 = vmatpush.msrb.mxu3 %v606_v45  ;;  %v726_v43 = vld [vmem:[#allocation6 + $0x430] sm:$0xff]  ;;  %v727_v45 = vld [vmem:[#allocation6 + $0x438] sm:$0xff] }
 0x125   : > { %650 = vmatpush.msrb.mxu0 %v571_v34  ;;  %690 = vmatpush.msrb.mxu2 %v572_v36  ;;  %v768_v36 = vld [vmem:[#allocation6 + $0x580] sm:$0xff] }
 0x126   : > { %670 = vmatpush.msrb.mxu1 %v603_v46  ;;  %710 = vmatpush.msrb.mxu3 %v604_v47  ;;  %v765_v46 = vld [vmem:[#allocation6 + $0x568] sm:$0xff]  ;;  %v724_v47 = vld [vmem:[#allocation6 + $0x420] sm:$0xff] }
 0x127   : > { %651 = vmatpush.msrb.mxu0 %v569_v38  ;;  %691 = vmatpush.msrb.mxu2 %v570_v40  ;;  %v769_v38 = vld [vmem:[#allocation6 + $0x588] sm:$0xff]  ;;  %v766_v40 = vld [vmem:[#allocation6 + $0x570] sm:$0xff] }
 0x128   : > { %671 = vmatpush.msrb.mxu1 %v601_v48  ;;  %711 = vmatpush.msrb.mxu3 %v602_v49  ;;  %v762_v48 = vld [vmem:[#allocation6 + $0x550] sm:$0xff]  ;;  %v725_v49 = vld [vmem:[#allocation6 + $0x428] sm:$0xff] }
 0x129   : > { %652 = vmatpush.msrb.mxu0 %v567_v42  ;;  %692 = vmatpush.msrb.mxu2 %v568_v44  ;;  %v767_v42 = vld [vmem:[#allocation6 + $0x578] sm:$0xff]  ;;  %v764_v44 = vld [vmem:[#allocation6 + $0x560] sm:$0xff] }
 0x12a   : > { %672 = vmatpush.msrb.mxu1 %v599_v50  ;;  %712 = vmatpush.msrb.mxu3 %v600_v51  ;;  %v763_v50 = vld [vmem:[#allocation6 + $0x558] sm:$0xff]  ;;  %v722_v51 = vld [vmem:[#allocation6 + $0x410] sm:$0xff] }
 0x15d   : > { %v410_v27 = vpop.permute.xlu0 %409 }
 0x15e   : > { %v412_v28 = vmul.f32 %v410_v27, %v404_v25  ;;  %v413_v29 = vmul.f32 %v410_v27, %v405_v26 }
 0x160   : > { %500 = vmatmul.f32.vlgmr.msra.gmra.mxu0 %v412_v28  ;;  %520 = vmatmul.f32.vlgmr.msra.gmra.mxu1 %v413_v29 }
 0x161   : > { %540 = vmatmul.f32.vlgmr.msra.gmra.mxu2 %v412_v28  ;;  %560 = vmatmul.f32.vlgmr.msra.gmra.mxu3 %v413_v29  ;;  %v481_v28 = vperm.slane %v478_v14, 1  ;;  %v784_v14 = vld [vmem:[%s1677_s2 + $0x4] sm:$0x3] }
 0x162   : > { %790 = vmatpush.msra.mxu0 %v750_v52  ;;  %830 = vmatpush.msra.mxu2 %v751_v53  ;;  %v760_v52 = vld [vmem:[#allocation6 + $0x540] sm:$0xff]  ;;  %v723_v53 = vld [vmem:[#allocation6 + $0x418] sm:$0xff] }
 0x163   : > { %810 = vmatpush.msra.mxu1 %v782_v58  ;;  %850 = vmatpush.msra.mxu3 %v783_v59  ;;  %v759_v58 = vld [vmem:[#allocation6 + $0x538] sm:$0xff]  ;;  %v756_v59 = vld [vmem:[#allocation6 + $0x520] sm:$0xff] }
 0x164   : > { %791 = vmatpush.msra.mxu0 %v748_v54  ;;  %831 = vmatpush.msra.mxu2 %v749_v55  ;;  %v761_v54 = vld [vmem:[#allocation6 + $0x548] sm:$0xff]  ;;  %v720_v55 = vld [vmem:[#allocation6 + $0x400] sm:$0xff] }
 0x165   : > { %811 = vmatpush.msra.mxu1 %v780_v60  ;;  %851 = vmatpush.msra.mxu3 %v781_v63  ;;  %v757_v60 = vld [vmem:[#allocation6 + $0x528] sm:$0xff]  ;;  %v752_v63 = vld [vmem:[#allocation6 + $0x500] sm:$0xff] }
 0x166   : > { %792 = vmatpush.msra.mxu0 %v746_v56  ;;  %832 = vmatpush.msra.mxu2 %v747_v57  ;;  %v758_v56 = vld [vmem:[#allocation6 + $0x530] sm:$0xff]  ;;  %v721_v57 = vld [vmem:[#allocation6 + $0x408] sm:$0xff] }
 0x167   : > { %812 = vmatpush.msra.mxu1 %v778_v0  ;;  %852 = vmatpush.msra.mxu3 %v779_v1  ;;  %v753_v0 = vld [vmem:[#allocation6 + $0x508] sm:$0xff]  ;;  %v631_v1 = vld [vmem:[%s1677_s2 + $0x2] sm:$0x3] }
 0x168   : > { %793 = vmatpush.msra.mxu0 %v744_v61  ;;  %833 = vmatpush.msra.mxu2 %v745_v62  ;;  %v754_v61 = vld [vmem:[#allocation6 + $0x510] sm:$0xff]  ;;  %v755_v62 = vld [vmem:[#allocation6 + $0x518] sm:$0xff] }
 0x169   : > { %813 = vmatpush.msra.mxu1 %v776_v4  ;;  %853 = vmatpush.msra.mxu3 %v777_v5 }
 0x16a   : > { %794 = vmatpush.msra.mxu0 %v742_v2  ;;  %834 = vmatpush.msra.mxu2 %v743_v3  ;;  %v633_v2 = vperm.slane %v631_v1, 0 }
 0x16b   : > { %814 = vmatpush.msra.mxu1 %v774_v8  ;;  %854 = vmatpush.msra.mxu3 %v775_v9 }
 0x16c   : > { %795 = vmatpush.msra.mxu0 %v740_v6  ;;  %835 = vmatpush.msra.mxu2 %v741_v7  ;;  %v634_v7 = vperm.slane %v631_v1, 1 }
 0x16d   : > { %815 = vmatpush.msra.mxu1 %v772_v12  ;;  %855 = vmatpush.msra.mxu3 %v773_v13 }
 0x16e   : > { %796 = vmatpush.msra.mxu0 %v738_v10  ;;  %836 = vmatpush.msra.mxu2 %v739_v11 }
 0x16f   : > { %816 = vmatpush.msra.mxu1 %v770_v17  ;;  %856 = vmatpush.msra.mxu3 %v771_v18 }
 0x170   : > { %797 = vmatpush.msra.mxu0 %v736_v15  ;;  %837 = vmatpush.msra.mxu2 %v737_v16  ;;  %v786_v15 = vperm.slane %v784_v14, 0 }
 0x171   : > { %817 = vmatpush.msra.mxu1 %v768_v36  ;;  %857 = vmatpush.msra.mxu3 %v769_v38 }
 0x172   : > { %798 = vmatpush.msra.mxu0 %v734_v19  ;;  %838 = vmatpush.msra.mxu2 %v735_v20  ;;  %v787_v20 = vperm.slane %v784_v14, 1 }
 0x173   : > { %818 = vmatpush.msra.mxu1 %v766_v40  ;;  %858 = vmatpush.msra.mxu3 %v767_v42 }
 0x174   : > { %799 = vmatpush.msra.mxu0 %v732_v22  ;;  %839 = vmatpush.msra.mxu2 %v733_v23 }
 0x175   : > { %819 = vmatpush.msra.mxu1 %v764_v44  ;;  %859 = vmatpush.msra.mxu3 %v765_v46 }
 0x176   : > { %800 = vmatpush.msra.mxu0 %v730_v35  ;;  %840 = vmatpush.msra.mxu2 %v731_v37 }
 0x177   : > { %820 = vmatpush.msra.mxu1 %v762_v48  ;;  %860 = vmatpush.msra.mxu3 %v763_v50 }
 0x178   : > { %801 = vmatpush.msra.mxu0 %v728_v39  ;;  %841 = vmatpush.msra.mxu2 %v729_v41 }
 0x179   : > { %821 = vmatpush.msra.mxu1 %v760_v52  ;;  %861 = vmatpush.msra.mxu3 %v761_v54 }
 0x17a   : > { %802 = vmatpush.msra.mxu0 %v726_v43  ;;  %842 = vmatpush.msra.mxu2 %v727_v45 }
 0x17b   : > { %822 = vmatpush.msra.mxu1 %v758_v56  ;;  %862 = vmatpush.msra.mxu3 %v759_v58 }
 0x17c   : > { %803 = vmatpush.msra.mxu0 %v724_v47  ;;  %843 = vmatpush.msra.mxu2 %v725_v49 }
 0x17d   : > { %823 = vmatpush.msra.mxu1 %v756_v59  ;;  %863 = vmatpush.msra.mxu3 %v757_v60 }
 0x17e   : > { %804 = vmatpush.msra.mxu0 %v722_v51  ;;  %844 = vmatpush.msra.mxu2 %v723_v53 }
 0x17f   : > { %824 = vmatpush.msra.mxu1 %v754_v61  ;;  %864 = vmatpush.msra.mxu3 %v755_v62 }
 0x180   : > { %805 = vmatpush.msra.mxu0 %v720_v55  ;;  %845 = vmatpush.msra.mxu2 %v721_v57 }
 0x181   : > { %825 = vmatpush.msra.mxu1 %v752_v63  ;;  %865 = vmatpush.msra.mxu3 %v753_v0 }
 0x1dd   : > { %v501_v24 = vpop.f32.mrf.mxu0  ;;  %v521_v26 = vpop.f32.mrf.mxu1 }
 0x1de   : > { %v502_v25 = vadd.f32 %v501_v24, %v480_v21 }
 0x1e0   : > { %v522_v27 = vadd.f32 %v521_v26, %v502_v25 }
 0x1e2   : > { %v564_v29 = vmax.f32 %v522_v27, 0.0 }
 0x1e4   : > { %v541_v30 = vpop.f32.mrf.mxu2  ;;  %653 = vmatmul.f32.vlgmr.msrb.gmra.mxu0 %v564_v29  ;;  %693 = vmatmul.f32.vlgmr.msrb.gmra.mxu2 %v564_v29  ;;  %v561_v32 = vpop.f32.mrf.mxu3 }
 0x1e5   : > { %v542_v31 = vadd.f32 %v541_v30, %v481_v28 }
 0x1e7   : > { %v562_v33 = vadd.f32 %v561_v32, %v542_v31 }
 0x1e9   : > { %v565_v34 = vmax.f32 %v562_v33, 0.0 }
 0x1eb   : > { %673 = vmatmul.f32.vlgmr.msrb.gmra.mxu1 %v565_v34  ;;  %713 = vmatmul.f32.vlgmr.msrb.gmra.mxu3 %v565_v34 }
 0x261   : > { %v654_v3 = vpop.f32.mrf.mxu0 }
 0x262   : > { %v655_v4 = vadd.f32 %v654_v3, %v633_v2 }
 0x267   : > { %v694_v8 = vpop.f32.mrf.mxu2 }
 0x268   : > { %v674_v5 = vpop.f32.mrf.mxu1  ;;  %v695_v10 = vadd.f32 %v694_v8, %v634_v7 }
 0x269   : > { %v675_v6 = vadd.f32 %v674_v5, %v655_v4 }
 0x26b   : > { %v717_v9 = vmax.f32 %v675_v6, 0.0 }
 0x26d   : > { %806 = vmatmul.f32.vlgmr.msra.gmra.mxu0 %v717_v9  ;;  %846 = vmatmul.f32.vlgmr.msra.gmra.mxu2 %v717_v9 }
 0x26e   : > { %v714_v11 = vpop.f32.mrf.mxu3 }
 0x26f   : > { %v715_v12 = vadd.f32 %v714_v11, %v695_v10 }
 0x271   : > { %v718_v13 = vmax.f32 %v715_v12, 0.0 }
 0x273   : > { %826 = vmatmul.f32.vlgmr.msra.gmra.mxu1 %v718_v13  ;;  %866 = vmatmul.f32.vlgmr.msra.gmra.mxu3 %v718_v13 }
 0x2ea   : > { %v807_v16 = vpop.f32.mrf.mxu0 }
 0x2eb   : > { %v808_v17 = vadd.f32 %v807_v16, %v786_v15 }
 0x2f0   : > { %v827_v18 = vpop.f32.mrf.mxu1  ;;  %v847_v21 = vpop.f32.mrf.mxu2 }
 0x2f1   : > { %v828_v19 = vadd.f32 %v827_v18, %v808_v17  ;;  %v848_v22 = vadd.f32 %v847_v21, %v787_v20 }
 0x2f3   : > { %870 = vst [vmem:[%s1534_s15] sm:$0xff] %v828_v19 }
 0x2f6   : > { %v867_v23 = vpop.f32.mrf.mxu3 }
 0x2f7   : > { %v868_v24 = vadd.f32 %v867_v23, %v848_v22 }
 0x2f9   : > { %871 = vst [vmem:[%s1534_s15 + $0x8] sm:$0xff] %v868_v24 }
 0x2fa PF: > { %s1027_s13 = sshll.u32 %s1322_s25, 4  ;;  %s1679_s17 = sld [smem:[#allocation20_spill]] }
 0x2fb   : > { %s886_s12 = sshll.u32 %s1534_s15, 4  ;;  %s873_s30 = scalar_lea.sflag [#allocation5], %s296_s3  ;;  %s887_s12 = int_to_ptr.vmem [resolvable:$true] %s886_s12 }
 0x300   : > { %s884_s29 = scalar_lea.hbm %s1679_s17, %s1027_s13  ;;  %s1228_s25 = scalar_lea.hbm %s1679_s17, 32 }
 0x301   : > { %s888_s10 = sshll.u32 %s884_s29, 4  ;;  %s889_s10 = int_to_ptr.hbm [resolvable:$true] %s888_s10 }
 0x302   : > { %s1222_s11 = sshra.s32 %s889_s10, 4  ;;  %s1223_s11 = int_to_ptr.hbm [resolvable:$true] %s1222_s11 }
 0x303   : > { %s1224_s24 = scalar_lea.hbm %s1223_s11, 16  ;;  %p1229_p6 = scmp.lt.s32.totalorder %s1223_s11, %s1679_s17 }
 0x304   : > { %p1225_p2 = scmp.ne.s32.totalorder %s1223_s11, %s1224_s24  ;;  %p1230_p8 = scmp.lt.s32.totalorder %s1228_s25, %s1224_s24 }
 0x306   : > { %p1226_p4 = pnand %p1225_p2, %p1442_p7  ;;  %p1231_p10 = por %p1230_p8, %p1229_p6 }
 0x308   : > { %p1227_p5 = pneg %p1226_p4 }
 0x30a   : > { %p1232_p12 = pnand %p1231_p10, %p1227_p5 }
 0x30c   : > { %1235 = shalt.err (!%p1232_p12)
}
 0x30d   : > { %1034 = dma.vmem_to_hbm [thread:$0]  (%p1442_p7), %s887_s12, 256, %s889_s10, %s873_s30  }
 0x30e PF: > { %s1680_s3 = sld [smem:[#allocation12_spill]]  ;;  %p1051_p13 = scmp.ge.s32.totalorder %s1334_s28, 2 }
 0x310   : > { %p1045_p11 = pnand %p1051_p13, %p1447_p9 }
 0x312   : > { %p1046_p0 = pneg %p1045_p11 }
 0x314   : > { %s900_s7 = sand.u32 1, %s1680_s3  }
 0x315   : > { %s901_s13 = scalar_lea.sflag [#allocation5], %s900_s7 }
 0x316   : > { %1289 = dma.done.wait (%p1046_p0), %s901_s13, 256  }
 0x317   : > { %1291 = vsyncadd (%p1046_p0), %s901_s13, 4294967040  ;;  %s22_s28 = sadd.s32 1, %s1334_s28   ;;  %s1682_s25 = sld [smem:[#allocation13_spill]] }
 0x318   : > { %p19_p1 = scmp.ge.s32.totalorder %s22_s28, 8   ;;  %s1683_s8 = sld [smem:[#allocation16_spill]] }
 0x319   : > { %s1684_s27 = sld [smem:[#allocation17_spill]]  ;;  %s1685_s18 = smov %s1298_s19 }
 0x31a   : > { %s1686_s19 = smov %s1302_s20  ;;  %s1687_s20 = smov %s1493_s21 }
 0x31b   : > { %s1688_s21 = smov %s1310_s22  ;;  %s1689_s22 = smov %s1314_s23 }
 0x31c   : > { %s1690_s23 = smov %s1485_s14  ;;  %s1691_s24 = smov %s1326_s26 }
 0x31d   :  { %21 = sbr.rel (!%p19_p1) target bundleno = 14 (0xe), region = 105 }
 0x31e   : > { %s1692_s26 = smov %s1683_s8 }
 0x322   :  { %907 = vsyncpa [#allocation4], 1 }
 0x323   :  { %909 = vsyncpa [#allocation4 + $0x1], 1 }
 0x324   :  { %910 = vsyncpa [#allocation7], 1 }
 0x325   :  { %911 = vsyncpa [#allocation5], 1 }
 0x326   :  { %913 = vsyncpa [#allocation5 + $0x1], 1 }

</bundles_post_ra>
